<compile_context>
chip_gen: v7x
topology: tpu7x:2x2x1
jax: 0.10.0
libtpu: 0.0.40
codegen_flags: <defaults>
</compile_context>

<pallas_src>
import functools

import jax
import jax.numpy as jnp
from jax.experimental import pallas as pl
from jax.experimental.pallas import tpu as pltpu

LAYER_DIM = 64
P_DROPOUT = 0.5      # unused at eval time (identity)
OUT_PAD = 128        # lane-dense padded output width; Q lives in the low n_actions lanes
MAX_TB = 1024        # batch tile size cap


def _round_up(x, m):
    return ((x + m - 1) // m) * m


def dueling_q_kernel(
    x_ref,                     # (TB, S)         bf16
    w1_ref, b1_ref,            # (S, 64)  bf16 / (1, 64)  f32
    w2_ref, b2_ref,            # (64, 64) bf16 / (1, 64)  f32
    wh1_ref, bh1_ref,          # (64, 128) bf16 = [wa1 | wv1] / (1, 128) f32
    wh2_ref, bh2_ref,          # (128, OUT_PAD) bf16 block-diag [[wa2, 0],[0, wv2]] / (1, OUT_PAD) f32
    q_ref,                     # (TB, OUT_PAD)   f32
    *,
    n_actions,
):
    bf16 = jnp.bfloat16
    x = x_ref[...]

    # ---- feature layer: Linear -> (Dropout=id) -> ReLU -> Linear -> (Dropout=id) -> ReLU
    h1 = jnp.dot(x, w1_ref[...], preferred_element_type=jnp.float32) + b1_ref[...]
    h1 = jnp.maximum(h1, 0.0)
    feat = jnp.dot(h1.astype(bf16), w2_ref[...], preferred_element_type=jnp.float32) + b2_ref[...]
    feat = jnp.maximum(feat, 0.0)                                   # (TB, 64) f32

    # ---- fused heads, layer 1: [a1 | v1] in one 128-wide matmul
    head1 = jnp.dot(feat.astype(bf16), wh1_ref[...], preferred_element_type=jnp.float32) + bh1_ref[...]
    head1 = jnp.maximum(head1, 0.0)                                 # (TB, 128) f32

    # ---- fused heads, layer 2: [adv (n_actions) | val (1) | zeros] in one lane-dense matmul
    head2 = jnp.dot(head1.astype(bf16), wh2_ref[...], preferred_element_type=jnp.float32) + bh2_ref[...]

    # ---- dueling combine: q = V + A - mean_a(A), done on the lane-dense slab with masks
    lane = jax.lax.broadcasted_iota(jnp.int32, head2.shape, dimension=1)
    adv_mask = lane < n_actions
    adv = jnp.where(adv_mask, head2, 0.0)
    adv_mean = jnp.sum(adv, axis=-1, keepdims=True) * (1.0 / n_actions)
    val = jnp.sum(jnp.where(lane == n_actions, head2, 0.0), axis=-1, keepdims=True)
    q = jnp.where(adv_mask, head2 + val - adv_mean, 0.0)
    q_ref[...] = q.astype(q_ref.dtype)


def _fuse_params(params, n_actions):
    """Build fused / MXU-friendly (bf16 weights, f32 biases) kernel arguments."""
    bf16 = jnp.bfloat16
    wh1 = jnp.concatenate([params["wa1"], params["wv1"]], axis=1)          # (64, 128)
    bh1 = jnp.concatenate([params["ba1"], params["bv1"]], axis=1)          # (1, 128)

    wh2 = jnp.zeros((2 * LAYER_DIM, OUT_PAD), jnp.float32)
    wh2 = wh2.at[:LAYER_DIM, :n_actions].set(params["wa2"])
    wh2 = wh2.at[LAYER_DIM:, n_actions:n_actions + 1].set(params["wv2"])   # (128, OUT_PAD)
    bh2 = jnp.zeros((1, OUT_PAD), jnp.float32)
    bh2 = bh2.at[:, :n_actions].set(params["ba2"])
    bh2 = bh2.at[:, n_actions:n_actions + 1].set(params["bv2"])            # (1, OUT_PAD)

    return (
        params["w1"].astype(bf16), params["b1"],
        params["w2"].astype(bf16), params["b2"],
        wh1.astype(bf16), bh1,
        wh2.astype(bf16), bh2,
    )


def dueling_q_forward(state, params):
    """state: (B, state_dim) float32. params: dict of (unfused) weights/biases."""
    B, state_dim = state.shape
    n_actions = params["wa2"].shape[1]

    # Batch tiling: pad B up to a multiple of the tile so the (8,128)-divisibility rule holds.
    B8 = _round_up(B, 8)
    TB = min(MAX_TB, B8)
    B_pad = _round_up(B8, TB)
    x = state.astype(jnp.bfloat16)
    if B_pad != B:
        x = jnp.pad(x, ((0, B_pad - B), (0, 0)))

    fused = _fuse_params(params, n_actions)
    args = (x,) + fused
    num_tiles = B_pad // TB

    def batch_map(i):
        return (i, 0)

    def const_map(i):
        return (0, 0)

    in_specs = [
        pl.BlockSpec((TB, state_dim), batch_map),                    # x
        pl.BlockSpec((state_dim, LAYER_DIM), const_map),             # w1
        pl.BlockSpec((1, LAYER_DIM), const_map),                     # b1
        pl.BlockSpec((LAYER_DIM, LAYER_DIM), const_map),             # w2
        pl.BlockSpec((1, LAYER_DIM), const_map),                     # b2
        pl.BlockSpec((LAYER_DIM, 2 * LAYER_DIM), const_map),         # wh1
        pl.BlockSpec((1, 2 * LAYER_DIM), const_map),                 # bh1
        pl.BlockSpec((2 * LAYER_DIM, OUT_PAD), const_map),           # wh2
        pl.BlockSpec((1, OUT_PAD), const_map),                       # bh2
    ]
    out_spec = pl.BlockSpec((TB, OUT_PAD), batch_map)

    flops = 2 * B_pad * (
        state_dim * LAYER_DIM + LAYER_DIM * LAYER_DIM
        + LAYER_DIM * 2 * LAYER_DIM + 2 * LAYER_DIM * OUT_PAD
    )
    weight_bytes = 2 * (
        state_dim * LAYER_DIM + LAYER_DIM * LAYER_DIM
        + LAYER_DIM * 2 * LAYER_DIM + 2 * LAYER_DIM * OUT_PAD
    ) + 4 * (LAYER_DIM + LAYER_DIM + 2 * LAYER_DIM + OUT_PAD)
    bytes_accessed = B_pad * state_dim * 2 + weight_bytes + B_pad * OUT_PAD * 4

    q_padded = pl.pallas_call(
        functools.partial(dueling_q_kernel, n_actions=n_actions),
        out_shape=jax.ShapeDtypeStruct((B_pad, OUT_PAD), jnp.float32),
        grid=(num_tiles,),
        in_specs=in_specs,
        out_specs=out_spec,
        compiler_params=pltpu.CompilerParams(
            dimension_semantics=("parallel",),
        ),
        cost_estimate=pl.CostEstimate(
            flops=int(flops), transcendentals=0, bytes_accessed=int(bytes_accessed)
        ),
    )(*args)

    return q_padded[:B, :n_actions]


def init_params(state_dim, n_actions, seed=0):
    """Deterministic PyTorch-style uniform(-1/sqrt(fan_in), 1/sqrt(fan_in)) init."""
    key = jax.random.PRNGKey(seed)

    def linear(key, in_dim, out_dim):
        kw, kb = jax.random.split(key)
        bound = 1.0 / jnp.sqrt(jnp.float32(in_dim))
        w = jax.random.uniform(kw, (in_dim, out_dim), jnp.float32, -bound, bound)
        b = jax.random.uniform(kb, (1, out_dim), jnp.float32, -bound, bound)
        return w, b

    keys = jax.random.split(key, 6)
    p = {}
    p["w1"], p["b1"] = linear(keys[0], state_dim, LAYER_DIM)
    p["w2"], p["b2"] = linear(keys[1], LAYER_DIM, LAYER_DIM)
    p["wa1"], p["ba1"] = linear(keys[2], LAYER_DIM, LAYER_DIM)
    p["wa2"], p["ba2"] = linear(keys[3], LAYER_DIM, n_actions)
    p["wv1"], p["bv1"] = linear(keys[4], LAYER_DIM, LAYER_DIM)
    p["wv2"], p["bv2"] = linear(keys[5], LAYER_DIM, 1)
    return p


def reference_forward_bf16(state, params):
    """Plain-JAX reference mirroring the kernel's precision (bf16 MXU operands, f32 accumulate)."""
    bf16 = jnp.bfloat16

    def lin(x, w, b):
        return jnp.dot(x.astype(bf16), w.astype(bf16), preferred_element_type=jnp.float32) + b

    h = jnp.maximum(lin(state, params["w1"], params["b1"]), 0.0)
    feat = jnp.maximum(lin(h, params["w2"], params["b2"]), 0.0)
    a1 = jnp.maximum(lin(feat, params["wa1"], params["ba1"]), 0.0)
    v1 = jnp.maximum(lin(feat, params["wv1"], params["bv1"]), 0.0)
    adv = lin(a1, params["wa2"], params["ba2"])
    val = lin(v1, params["wv2"], params["bv2"])
    return val + adv - adv.mean(axis=-1, keepdims=True)


def reference_forward_f32(state, params):
    """Pure-f32 eval-mode torch forward."""
    h = jnp.maximum(state @ params["w1"] + params["b1"], 0.0)
    feat = jnp.maximum(h @ params["w2"] + params["b2"], 0.0)
    a = jnp.maximum(feat @ params["wa1"] + params["ba1"], 0.0) @ params["wa2"] + params["ba2"]
    v = jnp.maximum(feat @ params["wv1"] + params["bv1"], 0.0) @ params["wv2"] + params["bv2"]
    return v + a - a.mean(axis=-1, keepdims=True)


if __name__ == "__main__":
    state_dim = 16
    n_actions = 4
    batch = 8

    params = init_params(state_dim, n_actions, seed=0)
    key = jax.random.PRNGKey(0)
    state = jax.random.normal(key, (batch, state_dim), jnp.float32)

    q = dueling_q_forward(state, params)
    q = jax.block_until_ready(q)
    assert q.shape == (batch, n_actions)

    q_ref_bf16 = reference_forward_bf16(state, params)
    q_ref_f32 = reference_forward_f32(state, params)
    assert jnp.allclose(q, q_ref_bf16, atol=1e-2, rtol=1e-2), "mismatch vs bf16-precision reference"
    assert jnp.allclose(q, q_ref_f32, atol=1e-1, rtol=1e-1), "mismatch vs f32 reference"

    print("KERNEL_OK")
</pallas_src>

<mosaic_0001>
module attributes {stable_mosaic.version = 11 : i64} {
  func.func @dueling_q_kernel(%arg0: i32, %arg1: memref<8x16xbf16, #tpu.memory_space<vmem>>, %arg2: memref<16x64xbf16, #tpu.memory_space<vmem>>, %arg3: memref<1x64xf32, #tpu.memory_space<vmem>>, %arg4: memref<64x64xbf16, #tpu.memory_space<vmem>>, %arg5: memref<1x64xf32, #tpu.memory_space<vmem>>, %arg6: memref<64x128xbf16, #tpu.memory_space<vmem>>, %arg7: memref<1x128xf32, #tpu.memory_space<vmem>>, %arg8: memref<128x128xbf16, #tpu.memory_space<vmem>>, %arg9: memref<1x128xf32, #tpu.memory_space<vmem>>, %arg10: memref<8x128xf32, #tpu.memory_space<vmem>>) attributes {dimension_semantics = [#tpu.dimension_semantics<parallel>], iteration_bounds = array<i64: 1>, scalar_prefetch = 0 : i64, scratch_operands = 0 : i64, tpu.core_type = #tpu.core_type<tc>, window_params = [{transform_indices = @transform_0, window_bounds = array<i64: 8, 16>}, {pipeline_mode = #tpu.pipeline_mode<synchronous>, transform_indices = @transform_1, window_bounds = array<i64: 16, 64>}, {pipeline_mode = #tpu.pipeline_mode<synchronous>, transform_indices = @transform_2, window_bounds = array<i64: 1, 64>}, {pipeline_mode = #tpu.pipeline_mode<synchronous>, transform_indices = @transform_3, window_bounds = array<i64: 64, 64>}, {pipeline_mode = #tpu.pipeline_mode<synchronous>, transform_indices = @transform_4, window_bounds = array<i64: 1, 64>}, {pipeline_mode = #tpu.pipeline_mode<synchronous>, transform_indices = @transform_5, window_bounds = array<i64: 64, 128>}, {pipeline_mode = #tpu.pipeline_mode<synchronous>, transform_indices = @transform_6, window_bounds = array<i64: 1, 128>}, {pipeline_mode = #tpu.pipeline_mode<synchronous>, transform_indices = @transform_7, window_bounds = array<i64: 128, 128>}, {pipeline_mode = #tpu.pipeline_mode<synchronous>, transform_indices = @transform_8, window_bounds = array<i64: 1, 128>}, {transform_indices = @transform_9, window_bounds = array<i64: 8, 128>}]} {
    %c0 = arith.constant 0 : index
    %c0_0 = arith.constant 0 : index
    %0 = vector.load %arg1[%c0, %c0_0] : memref<8x16xbf16, #tpu.memory_space<vmem>>, vector<8x16xbf16>
    %c0_1 = arith.constant 0 : index
    %c0_2 = arith.constant 0 : index
    %1 = vector.load %arg2[%c0_1, %c0_2] : memref<16x64xbf16, #tpu.memory_space<vmem>>, vector<16x64xbf16>
    %cst = arith.constant dense<0.000000e+00> : vector<8x64xf32>
    %2 = tpu.matmul %0, %1, %cst {dimension_numbers = #tpu.dot_dimension_numbers<[1], [0], [0], [1], [0, 0, 1, 1], [], []>} : vector<8x16xbf16>, vector<16x64xbf16>, vector<8x64xf32> -> vector<8x64xf32>
    %c0_3 = arith.constant 0 : index
    %c0_4 = arith.constant 0 : index
    %3 = vector.load %arg3[%c0_3, %c0_4] : memref<1x64xf32, #tpu.memory_space<vmem>>, vector<1x64xf32>
    %4 = vector.broadcast %3 : vector<1x64xf32> to vector<8x64xf32>
    %5 = arith.addf %2, %4 : vector<8x64xf32>
    %cst_5 = arith.constant 0.000000e+00 : f32
    %6 = vector.broadcast %cst_5 : f32 to vector<8x64xf32>
    %7 = arith.maximumf %5, %6 : vector<8x64xf32>
    %8 = arith.truncf %7 : vector<8x64xf32> to vector<8x64xbf16>
    %c0_6 = arith.constant 0 : index
    %c0_7 = arith.constant 0 : index
    %9 = vector.load %arg4[%c0_6, %c0_7] : memref<64x64xbf16, #tpu.memory_space<vmem>>, vector<64x64xbf16>
    %cst_8 = arith.constant dense<0.000000e+00> : vector<8x64xf32>
    %10 = tpu.matmul %8, %9, %cst_8 {dimension_numbers = #tpu.dot_dimension_numbers<[1], [0], [0], [1], [0, 0, 1, 1], [], []>} : vector<8x64xbf16>, vector<64x64xbf16>, vector<8x64xf32> -> vector<8x64xf32>
    %c0_9 = arith.constant 0 : index
    %c0_10 = arith.constant 0 : index
    %11 = vector.load %arg5[%c0_9, %c0_10] : memref<1x64xf32, #tpu.memory_space<vmem>>, vector<1x64xf32>
    %12 = vector.broadcast %11 : vector<1x64xf32> to vector<8x64xf32>
    %13 = arith.addf %10, %12 : vector<8x64xf32>
    %cst_11 = arith.constant 0.000000e+00 : f32
    %14 = vector.broadcast %cst_11 : f32 to vector<8x64xf32>
    %15 = arith.maximumf %13, %14 : vector<8x64xf32>
    %16 = arith.truncf %15 : vector<8x64xf32> to vector<8x64xbf16>
    %c0_12 = arith.constant 0 : index
    %c0_13 = arith.constant 0 : index
    %17 = vector.load %arg6[%c0_12, %c0_13] : memref<64x128xbf16, #tpu.memory_space<vmem>>, vector<64x128xbf16>
    %cst_14 = arith.constant dense<0.000000e+00> : vector<8x128xf32>
    %18 = tpu.matmul %16, %17, %cst_14 {dimension_numbers = #tpu.dot_dimension_numbers<[1], [0], [0], [1], [0, 0, 1, 1], [], []>} : vector<8x64xbf16>, vector<64x128xbf16>, vector<8x128xf32> -> vector<8x128xf32>
    %c0_15 = arith.constant 0 : index
    %c0_16 = arith.constant 0 : index
    %19 = vector.load %arg7[%c0_15, %c0_16] : memref<1x128xf32, #tpu.memory_space<vmem>>, vector<1x128xf32>
    %20 = vector.broadcast %19 : vector<1x128xf32> to vector<8x128xf32>
    %21 = arith.addf %18, %20 : vector<8x128xf32>
    %cst_17 = arith.constant 0.000000e+00 : f32
    %22 = vector.broadcast %cst_17 : f32 to vector<8x128xf32>
    %23 = arith.maximumf %21, %22 : vector<8x128xf32>
    %24 = arith.truncf %23 : vector<8x128xf32> to vector<8x128xbf16>
    %c0_18 = arith.constant 0 : index
    %c0_19 = arith.constant 0 : index
    %25 = vector.load %arg8[%c0_18, %c0_19] : memref<128x128xbf16, #tpu.memory_space<vmem>>, vector<128x128xbf16>
    %cst_20 = arith.constant dense<0.000000e+00> : vector<8x128xf32>
    %26 = tpu.matmul %24, %25, %cst_20 {dimension_numbers = #tpu.dot_dimension_numbers<[1], [0], [0], [1], [0, 0, 1, 1], [], []>} : vector<8x128xbf16>, vector<128x128xbf16>, vector<8x128xf32> -> vector<8x128xf32>
    %c0_21 = arith.constant 0 : index
    %c0_22 = arith.constant 0 : index
    %27 = vector.load %arg9[%c0_21, %c0_22] : memref<1x128xf32, #tpu.memory_space<vmem>>, vector<1x128xf32>
    %28 = vector.broadcast %27 : vector<1x128xf32> to vector<8x128xf32>
    %29 = arith.addf %26, %28 : vector<8x128xf32>
    %30 = tpu.iota {dimensions = array<i32: 1>} : vector<8x128xi32>
    %c4_i32 = arith.constant 4 : i32
    %31 = vector.broadcast %c4_i32 : i32 to vector<8x128xi32>
    %32 = arith.cmpi slt, %30, %31 : vector<8x128xi32>
    %cst_23 = arith.constant 0.000000e+00 : f32
    %33 = vector.broadcast %cst_23 : f32 to vector<8x128xf32>
    %34 = arith.select %32, %29, %33 : vector<8x128xi1>, vector<8x128xf32>
    %cst_24 = arith.constant dense<0.000000e+00> : vector<8xf32>
    %35 = vector.multi_reduction <add>, %34, %cst_24 [1] : vector<8x128xf32> to vector<8xf32>
    %36 = vector.shape_cast %35 : vector<8xf32> to vector<8x1xf32>
    %cst_25 = arith.constant 2.500000e-01 : f32
    %37 = vector.broadcast %cst_25 : f32 to vector<8x1xf32>
    %38 = arith.mulf %36, %37 : vector<8x1xf32>
    %c4_i32_26 = arith.constant 4 : i32
    %39 = vector.broadcast %c4_i32_26 : i32 to vector<8x128xi32>
    %40 = arith.cmpi eq, %30, %39 : vector<8x128xi32>
    %cst_27 = arith.constant 0.000000e+00 : f32
    %41 = vector.broadcast %cst_27 : f32 to vector<8x128xf32>
    %42 = arith.select %40, %29, %41 : vector<8x128xi1>, vector<8x128xf32>
    %cst_28 = arith.constant dense<0.000000e+00> : vector<8xf32>
    %43 = vector.multi_reduction <add>, %42, %cst_28 [1] : vector<8x128xf32> to vector<8xf32>
    %44 = vector.shape_cast %43 : vector<8xf32> to vector<8x1xf32>
    %45 = vector.broadcast %44 : vector<8x1xf32> to vector<8x128xf32>
    %46 = arith.addf %29, %45 : vector<8x128xf32>
    %47 = vector.broadcast %38 : vector<8x1xf32> to vector<8x128xf32>
    %48 = arith.subf %46, %47 : vector<8x128xf32>
    %cst_29 = arith.constant 0.000000e+00 : f32
    %49 = vector.broadcast %cst_29 : f32 to vector<8x128xf32>
    %50 = arith.select %32, %48, %49 : vector<8x128xi1>, vector<8x128xf32>
    %c0_30 = arith.constant 0 : index
    %c0_31 = arith.constant 0 : index
    %51 = vector.load %arg10[%c0_30, %c0_31] : memref<8x128xf32, #tpu.memory_space<vmem>>, vector<8x128xf32>
    tpu.vector_store %arg10[%c0_30, %c0_31], %50 {strides = array<i32>} : memref<8x128xf32, #tpu.memory_space<vmem>>, vector<8x128xf32>,
    return
  }
  func.func @transform_0(%arg0: i32) -> (i32, i32) {
    %c0_i32 = arith.constant 0 : i32
    %c0_i32_0 = arith.constant 0 : i32
    return %arg0, %c0_i32 : i32, i32
  }
  func.func @transform_1(%arg0: i32) -> (i32, i32) {
    %c0_i32 = arith.constant 0 : i32
    %c0_i32_0 = arith.constant 0 : i32
    %c0_i32_1 = arith.constant 0 : i32
    return %c0_i32, %c0_i32_0 : i32, i32
  }
  func.func @transform_2(%arg0: i32) -> (i32, i32) {
    %c0_i32 = arith.constant 0 : i32
    %c0_i32_0 = arith.constant 0 : i32
    %c0_i32_1 = arith.constant 0 : i32
    return %c0_i32, %c0_i32_0 : i32, i32
  }
  func.func @transform_3(%arg0: i32) -> (i32, i32) {
    %c0_i32 = arith.constant 0 : i32
    %c0_i32_0 = arith.constant 0 : i32
    %c0_i32_1 = arith.constant 0 : i32
    return %c0_i32, %c0_i32_0 : i32, i32
  }
  func.func @transform_4(%arg0: i32) -> (i32, i32) {
    %c0_i32 = arith.constant 0 : i32
    %c0_i32_0 = arith.constant 0 : i32
    %c0_i32_1 = arith.constant 0 : i32
    return %c0_i32, %c0_i32_0 : i32, i32
  }
  func.func @transform_5(%arg0: i32) -> (i32, i32) {
    %c0_i32 = arith.constant 0 : i32
    %c0_i32_0 = arith.constant 0 : i32
    %c0_i32_1 = arith.constant 0 : i32
    return %c0_i32, %c0_i32_0 : i32, i32
  }
  func.func @transform_6(%arg0: i32) -> (i32, i32) {
    %c0_i32 = arith.constant 0 : i32
    %c0_i32_0 = arith.constant 0 : i32
    %c0_i32_1 = arith.constant 0 : i32
    return %c0_i32, %c0_i32_0 : i32, i32
  }
  func.func @transform_7(%arg0: i32) -> (i32, i32) {
    %c0_i32 = arith.constant 0 : i32
    %c0_i32_0 = arith.constant 0 : i32
    %c0_i32_1 = arith.constant 0 : i32
    return %c0_i32, %c0_i32_0 : i32, i32
  }
  func.func @transform_8(%arg0: i32) -> (i32, i32) {
    %c0_i32 = arith.constant 0 : i32
    %c0_i32_0 = arith.constant 0 : i32
    %c0_i32_1 = arith.constant 0 : i32
    return %c0_i32, %c0_i32_0 : i32, i32
  }
  func.func @transform_9(%arg0: i32) -> (i32, i32) {
    %c0_i32 = arith.constant 0 : i32
    %c0_i32_0 = arith.constant 0 : i32
    return %arg0, %c0_i32 : i32, i32
  }
}

</mosaic_0001>

<bundles_post_ra>
// kernel: tpu_custom_call.1
= control target key start
LH: loop header
LB: loop body
LE: loop exit
PB: predicated region body
PF: predicated region fallthrough
CT: control target
= control target key end

     0   :  { %14 = vsyncpa [#allocation3], 0  ;;  %s921_s0 = inlined_call_operand.hbm [shape: bf16[8,16], index: 0, kind: input, shape index: {}]   ;;  %s922_s1 = inlined_call_operand.hbm [shape: bf16[16,64], index: 1, kind: input, shape index: {}]   ;;  %s923_s2 = inlined_call_operand.vmem [shape: f32[1,64], index: 2, kind: input, shape index: {}]   ;;  %s924_s3 = inlined_call_operand.hbm [shape: bf16[64,64], index: 3, kind: input, shape index: {}]   ;;  %s925_s4 = inlined_call_operand.vmem [shape: f32[1,64], index: 4, kind: input, shape index: {}]   ;;  %s926_s5 = inlined_call_operand.hbm [shape: bf16[64,128], index: 5, kind: input, shape index: {}]   ;;  %s927_s6 = inlined_call_operand.vmem [shape: f32[1,128], index: 6, kind: input, shape index: {}]   ;;  %s928_s7 = inlined_call_operand.hbm [shape: bf16[128,128], index: 7, kind: input, shape index: {}]   ;;  %s929_s8 = inlined_call_operand.vmem [shape: f32[1,128], index: 8, kind: input, shape index: {}]   ;;  %s930_s9 = inlined_call_operand.hbm [shape: f32[8,128], index: 9, kind: output, shape index: {}]  }
   0x1   :  { %15 = vsyncpa [#allocation6], 0 }
   0x2   :  { %16 = vsyncpa [#allocation9], 0 }
   0x3   :  { %17 = vsyncpa [#allocation4], 0  ;;  %s736_s30 = smov [#allocation5]   ;;  %s596_s13 = scalar_lea.hbm %s922_s1, 128 }
   0x4   :  { %s33_s10 = sshll.u32 %s736_s30, 4  ;;  %p597_p0 = scmp.ne.s32.totalorder %s922_s1, %s596_s13  ;;  %s34_s10 = int_to_ptr.vmem [resolvable:$true] %s33_s10 }
   0x5   :  { %p600_p1 = scmp.lt.u32.totalorder %s596_s13, %s922_s1 }
   0x7   :  { %p602_p2 = pnand %p600_p1, %p597_p0 }
   0x9   :  { %605 = shalt.err (!%p602_p2)
}
   0xa   :  { %s606_s18 = scalar_lea.vmem %s34_s10, 128  ;;  %p611_p4 = scmp.lt.s32.totalorder %s34_s10, %s34_s10 }
   0xb   :  { %p607_p3 = scmp.ne.s32.totalorder %s34_s10, %s606_s18  ;;  %p612_p5 = scmp.lt.s32.totalorder %s606_s18, %s606_s18 }
   0xd   :  { %p613_p6 = por %p612_p5, %p611_p4 }
   0xf   :  { %p614_p7 = pnand %p613_p6, %p607_p3 }
  0x11   :  { %617 = shalt.err (!%p614_p7)
}
  0x12   :  { %s737_s19 = smov 64   ;;  %s738_s20 = smov 4  }
  0x13   :  { %39 = dma.hbm_to_vmem [thread:$0]  %s922_s1, 128, %s34_s10, [#allocation6], %s737_s19, %s737_s19, %s738_s20  }
  0x14   :  { %s739_s23 = smov [#allocation8]   ;;  %s740_s25 = smov [#allocation2]  }
  0x15   :  { %s61_s24 = sshll.u32 %s739_s23, 4  ;;  %s24_s26 = sshll.u32 %s740_s25, 4  ;;  %s62_s24 = int_to_ptr.vmem [resolvable:$true] %s61_s24  ;;  %s25_s26 = int_to_ptr.vmem [resolvable:$true] %s24_s26 }
  0x16   :  { %s618_s29 = scalar_lea.hbm %s926_s5, 512 }
  0x17   :  { %p619_p8 = scmp.ne.s32.totalorder %s926_s5, %s618_s29  ;;  %p622_p9 = scmp.lt.u32.totalorder %s618_s29, %s926_s5 }
  0x19   :  { %p624_p10 = pnand %p622_p9, %p619_p8 }
  0x1b   :  { %627 = shalt.err (!%p624_p10)
}
  0x1c   :  { %s628_s1 = scalar_lea.vmem %s62_s24, 512  ;;  %p633_p12 = scmp.lt.s32.totalorder %s62_s24, %s62_s24 }
  0x1d   :  { %p629_p11 = scmp.ne.s32.totalorder %s62_s24, %s628_s1  ;;  %p634_p13 = scmp.lt.s32.totalorder %s628_s1, %s628_s1 }
  0x1f   :  { %p635_p0 = por %p634_p13, %p633_p12 }
  0x21   :  { %p636_p1 = pnand %p635_p0, %p629_p11 }
  0x23   :  { %639 = shalt.err (!%p636_p1)
}
  0x24   :  { %67 = dma.hbm_to_vmem [thread:$0]  %s926_s5, 512, %s62_s24, [#allocation9], %s737_s19, %s737_s19, %s738_s20  }
  0x25   :  { %s640_s17 = scalar_lea.hbm %s921_s0, 64 }
  0x26   :  { %p641_p2 = scmp.ne.s32.totalorder %s921_s0, %s640_s17  ;;  %p644_p3 = scmp.lt.u32.totalorder %s640_s17, %s921_s0 }
  0x28   :  { %p646_p4 = pnand %p644_p3, %p641_p2 }
  0x2a   :  { %649 = shalt.err (!%p646_p4)
}
  0x2b   :  { %s650_s25 = scalar_lea.vmem %s25_s26, 64  ;;  %p655_p6 = scmp.lt.s32.totalorder %s25_s26, %s25_s26 }
  0x2c   :  { %p651_p5 = scmp.ne.s32.totalorder %s25_s26, %s650_s25  ;;  %p656_p7 = scmp.lt.s32.totalorder %s650_s25, %s650_s25 }
  0x2e   :  { %p657_p8 = por %p656_p7, %p655_p6 }
  0x30   :  { %p658_p9 = pnand %p657_p8, %p651_p5 }
  0x32   :  { %661 = shalt.err (!%p658_p9)
}
  0x33   :  { %27 = dma.hbm_to_vmem [thread:$0]  %s921_s0, 64, %s25_s26, [#allocation3]  }
  0x34   :  { %s741_s27 = smov [#allocation7]   ;;  %s742_s29 = smov [#allocation10]  }
  0x35   :  { %s47_s28 = sshll.u32 %s741_s27, 4  ;;  %s75_s30 = sshll.u32 %s742_s29, 4  ;;  %s48_s28 = int_to_ptr.vmem [resolvable:$true] %s47_s28  ;;  %s76_s30 = int_to_ptr.vmem [resolvable:$true] %s75_s30 }
  0x36   :  { %s662_s13 = scalar_lea.hbm %s924_s3, 512 }
  0x37   :  { %p663_p10 = scmp.ne.s32.totalorder %s924_s3, %s662_s13  ;;  %p666_p11 = scmp.lt.u32.totalorder %s662_s13, %s924_s3 }
  0x39   :  { %p668_p12 = pnand %p666_p11, %p663_p10 }
  0x3b   :  { %671 = shalt.err (!%p668_p12)
}
  0x3c   :  { %s672_s0 = scalar_lea.vmem %s48_s28, 512  ;;  %p677_p0 = scmp.lt.s32.totalorder %s48_s28, %s48_s28 }
  0x3d   :  { %p673_p13 = scmp.ne.s32.totalorder %s48_s28, %s672_s0  ;;  %p678_p1 = scmp.lt.s32.totalorder %s672_s0, %s672_s0 }
  0x3f   :  { %p679_p2 = por %p678_p1, %p677_p0 }
  0x41   :  { %p680_p3 = pnand %p679_p2, %p673_p13 }
  0x43   :  { %683 = shalt.err (!%p680_p3)
}
  0x44   :  { %53 = dma.hbm_to_vmem [thread:$0]  %s924_s3, 512, %s48_s28, [#allocation6], %s737_s19, %s737_s19, %s738_s20  }
  0x45   :  { %s684_s21 = scalar_lea.hbm %s928_s7, 1024 }
  0x46   :  { %p685_p4 = scmp.ne.s32.totalorder %s928_s7, %s684_s21  ;;  %p688_p5 = scmp.lt.u32.totalorder %s684_s21, %s928_s7 }
  0x48   :  { %p690_p6 = pnand %p688_p5, %p685_p4 }
  0x4a   :  { %693 = shalt.err (!%p690_p6)
}
  0x4b   :  { %s694_s24 = scalar_lea.vmem %s76_s30, 1024  ;;  %p699_p8 = scmp.lt.s32.totalorder %s76_s30, %s76_s30 }
  0x4c   :  { %p695_p7 = scmp.ne.s32.totalorder %s76_s30, %s694_s24  ;;  %p700_p9 = scmp.lt.s32.totalorder %s694_s24, %s694_s24 }
  0x4e   :  { %p701_p10 = por %p700_p9, %p699_p8 }
  0x50   :  { %p702_p11 = pnand %p701_p10, %p695_p7 }
  0x52   :  { %705 = shalt.err (!%p702_p11)
}
  0x53   :  { %81 = dma.hbm_to_vmem [thread:$0]  %s928_s7, 1024, %s76_s30, [#allocation9], %s737_s19, %s737_s19, %s738_s20  }
  0x54   :  { %728 = dma.done.wait [#allocation3], 64  }
  0x55   :  { %729 = vsyncadd [#allocation3], 4294967232 }
  0x56   :  { %730 = dma.done.wait [#allocation6], 640  }
  0x57   :  { %731 = vsyncadd [#allocation6], 4294966656 }
  0x58   :  { %732 = dma.done.wait [#allocation9], 1536  }
  0x59   :  { %733 = vsyncadd [#allocation9], 4294965760  ;;  %v743_v0 = vmov 0.0   ;;  %vm744_vm0 = vmmov 0   ;;  %v579_v1 = vld [vmem:[#allocation5] sm:$0xff]   ;;  %vm116_vm1 = vcmask 130048   ;;  %v442_v43 = vlaneseq }
  0x5a   :  { %519 = vmatprep.subr.bf16.mxu0 %v743_v0  ;;  %521 = vmatprep.mubr.msk.bf16.mxu0 %vm744_vm0, %v743_v0  ;;  %v100_v2 = vld [vmem:[#allocation2] sm:$0xf]  ;;  %v580_v3 = vld [vmem:[#allocation7] sm:$0xff]   ;;  %v581_v4 = vld [vmem:[#allocation7 + $0x8] sm:$0xff]   ;;  %vm201_vm2 = vcmask 523264  }
  0x5b   :  { %549 = vmatprep.subr.bf16.mxu1 %v743_v0  ;;  %565 = vmatprep.mubr.msk.bf16.mxu1 %vm744_vm0, %v743_v0  ;;  %v582_v5 = vld [vmem:[#allocation7 + $0x10] sm:$0xff]   ;;  %v583_v6 = vld [vmem:[#allocation7 + $0x18] sm:$0xff]   ;;  %v584_v14 = vld [vmem:[#allocation8] sm:$0xff]   ;;  %v443_v44 = vand.u32 127, %v442_v43 }
  0x5c   :  { %520 = vmatpush3.bf16.msra.mxu0 %v579_v1  ;;  %v474_v7 = vld [vmem:[%s923_s2] ss:$0 sm:$0xff]  ;;  %v585_v16 = vld [vmem:[#allocation8 + $0x8] sm:$0xff]   ;;  %v587_v18 = vld [vmem:[#allocation8 + $0x18] sm:$0xff]  }
  0x5d   :  { %525 = vmatprep.subr.bf16.mxu0 %v743_v0  ;;  %v586_v17 = vld [vmem:[#allocation8 + $0x10] sm:$0xff]   ;;  %v588_v19 = vld [vmem:[#allocation10] sm:$0xff]   ;;  %v589_v20 = vld [vmem:[#allocation10 + $0x8] sm:$0xff]   ;;  %vm444_vm3 = vcmp.lt.s32.totalorder %v443_v44, 4  ;;  %vm449_vm4 = vcmp.eq.s32.totalorder %v443_v44, 4 }
  0x5e   :  { %550 = vmatpush3.bf16.msra.mxu1 %v588_v19  ;;  %v590_v21 = vld [vmem:[#allocation10 + $0x10] sm:$0xff]   ;;  %v591_v22 = vld [vmem:[#allocation10 + $0x18] sm:$0xff]   ;;  %v592_v23 = vld [vmem:[#allocation10 + $0x20] sm:$0xff]  }
  0x5f   :  { %522 = vmatmul.mubr.msk.bf16.vlgmr.msra.gmra.mrb[0].mxu0 %vm116_vm1, %v100_v2  ;;  %551 = vmatprep.subr.bf16.mxu1 %v743_v0  ;;  %v593_v24 = vld [vmem:[#allocation10 + $0x28] sm:$0xff]   ;;  %v477_v25 = vld [vmem:[%s925_s4] ss:$0 sm:$0xff]  ;;  %v595_v34 = vld [vmem:[#allocation10 + $0x38] sm:$0xff]  }
  0x60   :  { %526 = vmatpush3.bf16.msra.mxu0 %v580_v3  ;;  %533 = vmatprep.mubr.msk.bf16.mxu0 %vm744_vm0, %v743_v0  ;;  %v594_v33 = vld [vmem:[#allocation10 + $0x30] sm:$0xff]  }
  0x61   :  { %527 = vmatprep.subr.bf16.mxu0 %v743_v0  ;;  %v483_v35 = vld [vmem:[%s927_s6] ss:$0 sm:$0xff]  ;;  %s745_s6 = smov [#allocation11]  }
  0x62   :  { %552 = vmatpush3.bf16.msra.mxu1 %v589_v20  ;;  %v489_v45 = vld [vmem:[%s929_s8] ss:$0 sm:$0xff]  ;;  %s463_s11 = sshll.u32 %s745_s6, 4  ;;  %s464_s11 = int_to_ptr.vmem [resolvable:$true] %s463_s11 }
  0x63   :  { %553 = vmatprep.subr.bf16.mxu1 %v743_v0  ;;  %s706_s8 = scalar_lea.vmem %s464_s11, 128  ;;  %p711_p13 = scmp.lt.s32.totalorder %s464_s11, %s464_s11 }
  0x64   :  { %528 = vmatpush3.bf16.msra.mxu0 %v581_v4  ;;  %p707_p12 = scmp.ne.s32.totalorder %s464_s11, %s706_s8  ;;  %p712_p0 = scmp.lt.s32.totalorder %s706_s8, %s706_s8 }
  0x65   :  { %529 = vmatprep.subr.bf16.mxu0 %v743_v0 }
  0x66   :  { %554 = vmatpush3.bf16.msra.mxu1 %v590_v21  ;;  %p713_p1 = por %p712_p0, %p711_p13 }
  0x67   :  { %555 = vmatprep.subr.bf16.mxu1 %v743_v0 }
  0x68   :  { %530 = vmatpush3.bf16.msra.mxu0 %v582_v5  ;;  %p714_p2 = pnand %p713_p1, %p707_p12 }
  0x69   :  { %531 = vmatprep.subr.bf16.mxu0 %v743_v0 }
  0x6a   :  { %556 = vmatpush3.bf16.msra.mxu1 %v591_v22 }
  0x6b   :  { %557 = vmatprep.subr.bf16.mxu1 %v743_v0 }
  0x6c   :  { %532 = vmatpush3.bf16.msra.mxu0 %v583_v6 }
  0x6d   :  { %537 = vmatprep.subr.bf16.mxu0 %v743_v0 }
  0x6e   :  { %558 = vmatpush3.bf16.msra.mxu1 %v592_v23 }
  0x6f   :  { %559 = vmatprep.subr.bf16.mxu1 %v743_v0 }
  0x72   :  { %560 = vmatpush3.bf16.msra.mxu1 %v593_v24 }
  0x73   :  { %561 = vmatprep.subr.bf16.mxu1 %v743_v0 }
  0x76   :  { %562 = vmatpush3.bf16.msra.mxu1 %v594_v33 }
  0x77   :  { %563 = vmatprep.subr.bf16.mxu1 %v743_v0 }
  0x7a   :  { %564 = vmatpush3.bf16.msra.mxu1 %v595_v34 }
 0x132   :  { %v154_v8 = vpop.f32.mrb[0].mxu0 }
 0x133   :  { %v155_v9 = vadd.f32 %v474_v7, %v154_v8  ;;  %v523_v10 = vpop.f32.mrb[1].mxu0 }
 0x134   :  { %v157_v11 = vpop.f32.mrb[2].mxu0 }
 0x135   :  { %v160_v12 = vmax.f32 %v155_v9, 0.0  ;;  %v524_v13 = vpop.f32.mrb[3].mxu0 }
 0x137   :  { %v161_v15 = vpack.c.bf16 %v160_v12, %v160_v12 }
 0x139   :  { %534 = vmatmul.mubr.msk.bf16.vlgmr.msra.gmra.mrb[4].mxu0 %vm201_vm2, %v161_v15 }
 0x13a   :  { %538 = vmatpush3.bf16.msra.mxu0 %v584_v14  ;;  %545 = vmatprep.mubr.msk.bf16.mxu0 %vm744_vm0, %v743_v0 }
 0x13b   :  { %539 = vmatprep.subr.bf16.mxu0 %v743_v0 }
 0x13e   :  { %540 = vmatpush3.bf16.msra.mxu0 %v585_v16 }
 0x13f   :  { %541 = vmatprep.subr.bf16.mxu0 %v743_v0 }
 0x142   :  { %542 = vmatpush3.bf16.msra.mxu0 %v586_v17 }
 0x143   :  { %543 = vmatprep.subr.bf16.mxu0 %v743_v0 }
 0x146   :  { %544 = vmatpush3.bf16.msra.mxu0 %v587_v18 }
 0x20c   :  { %v239_v26 = vpop.f32.mrb[4].mxu0 }
 0x20d   :  { %v240_v27 = vadd.f32 %v477_v25, %v239_v26  ;;  %v535_v28 = vpop.f32.mrb[5].mxu0 }
 0x20e   :  { %v242_v29 = vpop.f32.mrb[6].mxu0 }
 0x20f   :  { %v245_v30 = vmax.f32 %v240_v27, 0.0  ;;  %v536_v31 = vpop.f32.mrb[7].mxu0 }
 0x211   :  { %v246_v32 = vpack.c.bf16 %v245_v30, %v245_v30 }
 0x213   :  { %546 = vmatmul.mubr.msk.bf16.vlgmr.msra.gmra.mrb[8].mxu0 %vm201_vm2, %v246_v32 }
 0x2e6   :  { %v323_v36 = vpop.f32.mrb[8].mxu0 }
 0x2e7   :  { %v324_v37 = vadd.f32 %v483_v35, %v323_v36  ;;  %v547_v38 = vpop.f32.mrb[9].mxu0 }
 0x2e8   :  { %v326_v39 = vpop.f32.mrb[10].mxu0 }
 0x2e9   :  { %v329_v40 = vmax.f32 %v324_v37, 0.0  ;;  %v548_v41 = vpop.f32.mrb[11].mxu0 }
 0x2eb   :  { %v330_v42 = vpack.c.bf16 %v329_v40, %v329_v40 }
 0x2ed   :  { %566 = vmatmul.mubr.bf16.vlgmr.msra.gmra.mrb[0].mxu1 %v330_v42 }
 0x3c0   :  { %v436_v46 = vpop.f32.mrb[0].mxu1 }
 0x3c1   :  { %v437_v47 = vadd.f32 %v489_v45, %v436_v46  ;;  %v567_v48 = vpop.f32.mrb[1].mxu1 }
 0x3c2   :  { %v439_v49 = vpop.f32.mrb[2].mxu1 }
 0x3c3   :  { %v568_v50 = vpop.f32.mrb[3].mxu1  ;;  %v445_v51 = vsel %vm444_vm3, %v437_v47, 0.0  ;;  %v450_v52 = vsel %vm449_vm4, %v437_v47, 0.0 }
 0x3c4   :  { %446 = vadd.xlane.f32.xlu0 %v445_v51 }
 0x3c8   :  { %451 = vadd.xlane.f32.xlu0 %v450_v52 }
 0x451   :  { %v447_v53 = vpop.xlane.xlu0 %446 }
 0x452   :  { %v448_v55 = vmul.f32 0.25, %v447_v53 }
 0x455   :  { %v452_v54 = vpop.xlane.xlu0 %451 }
 0x456   :  { %v453_v56 = vadd.f32 %v452_v54, %v437_v47 }
 0x458   :  { %v454_v57 = vsub.f32 %v453_v56, %v448_v55 }
 0x45a   :  { %v455_v58 = vsel %vm444_vm3, %v454_v57, 0.0 }
 0x45b   :  { %456 = vst [vmem:[#allocation11] sm:$0xff] %v455_v58 }
 0x45c   :  { %717 = shalt.err (!%p714_p2)
}
 0x45d   :  { %s718_s1 = scalar_lea.hbm %s930_s9, 128 }
 0x45e   :  { %p719_p3 = scmp.ne.s32.totalorder %s930_s9, %s718_s1  ;;  %p722_p4 = scmp.lt.u32.totalorder %s718_s1, %s930_s9 }
 0x460   :  { %p724_p5 = pnand %p722_p4, %p719_p3 }
 0x462   :  { %727 = shalt.err (!%p724_p5)
}
 0x463   :  { %466 = dma.vmem_to_hbm [thread:$0]  %s464_s11, 128, %s930_s9, [#allocation4]  }
 0x464   :  { %734 = dma.done.wait [#allocation4], 128  }
 0x465   :  { %735 = vsyncadd [#allocation4], 4294967168 }
 0x466   :  { %470 = vsyncpa [#allocation3], 1 }
 0x467   :  { %471 = vsyncpa [#allocation6], 1 }
 0x468   :  { %472 = vsyncpa [#allocation9], 1 }
 0x469   :  { %473 = vsyncpa [#allocation4], 1 }

</bundles_post_ra>
